<compile_context>
chip_gen: v7x
topology: tpu7x:2x2x1
jax: 0.10.0
libtpu: 0.0.40
codegen_flags: <defaults>
</compile_context>

<pallas_src>
import functools

import jax
import jax.numpy as jnp
import numpy as np
from jax.experimental import pallas as pl
from jax.experimental.pallas import tpu as pltpu

CIN = 3
COUT = 64
KSIZE = 3
BN_EPS = 1e-5

_CIFAR_MEAN = jnp.array([0.4914, 0.4822, 0.4465], jnp.float32)
_CIFAR_STD = jnp.array([0.2471, 0.2435, 0.2616], jnp.float32)


def _cifar_mse_kernel(lhs_ref, wb_ref, sc_ref, bnb_ref, out_ref, *, h):
    """One batch tile.

    lhs_ref : (2*nb*H, 3*(W+2)) bf16  pre-stacked conv LHS rows; first nb*H rows
                                      are x images, last nb*H rows are y images.
    wb_ref  : (3*(W+2), W*COUT) bf16  merged banded conv weights (3 kernel rows).
    sc_ref  : (1, 1, W*COUT)    f32   folded eval-BN per-channel scale, (j,o)-tiled.
    bnb_ref : (1, H, W*COUT)    f32   (conv bias + pad-border + normalization shift
                                      map) * scale + BN shift, folded once.
    out_ref : (1, 8, 128)       f32   lane 0: sum|conv_x - conv_y|,
                                      lane 1: sum|relu(bn(conv_x)) - relu(bn(conv_y))|.
    """
    rows = lhs_ref.shape[0]
    nc = wb_ref.shape[1]                      # W * COUT (multiple of 128 -> lane dense)

    # Single MXU matmul with K = 3*(W+2) (one dot instead of 3 dots + VPU adds).
    acc = jnp.dot(lhs_ref[...], wb_ref[...], preferred_element_type=jnp.float32)

    nb = rows // (2 * h)
    acc3 = acc.reshape(2 * nb, h, nc)         # leading-dim split only: free retile
    ax = acc3[:nb]
    ay = acc3[nb:]

    # Loss after net[0] (Conv2d): the folded bias/shift map cancels in the diff.
    s0 = jnp.sum(jnp.abs(ax - ay))

    # net[1] eval-BatchNorm + net[2] ReLU, with the conv constant map folded into
    # bn_base so only one fused multiply-add per element is needed.
    sc = sc_ref[...]
    bnb = bnb_ref[...]
    s1 = jnp.sum(jnp.abs(jnp.maximum(ax * sc + bnb, 0.0)
                         - jnp.maximum(ay * sc + bnb, 0.0)))

    lane = jax.lax.broadcasted_iota(jnp.int32, out_ref.shape, 2)
    out_ref[...] = jnp.where(lane == 0, s0, jnp.where(lane == 1, s1, 0.0))


def init_params(key):
    """Deterministic synthetic stand-ins for the pretrained vgg11_bn[:4] params."""
    k = jax.random.split(key, 6)
    return dict(
        w=jax.random.normal(k[0], (COUT, CIN, KSIZE, KSIZE), jnp.float32) * 0.1,  # OIHW
        b=jax.random.normal(k[1], (COUT,), jnp.float32) * 0.1,
        gamma=1.0 + 0.1 * jax.random.normal(k[2], (COUT,), jnp.float32),
        beta=0.1 * jax.random.normal(k[3], (COUT,), jnp.float32),
        r_mean=0.1 * jax.random.normal(k[4], (COUT,), jnp.float32),
        r_var=jax.random.uniform(k[5], (COUT,), jnp.float32, 0.5, 1.5),
    )


def _fold_params(params, H, W):
    """Fold preprocessing + conv bias + pad-border effects + eval BN into constants."""
    Wp = W + 2
    a = 0.5 / _CIFAR_STD                       # per-RGB-channel gain on the raw image
    d = (0.5 - _CIFAR_MEAN) / _CIFAR_STD       # per-RGB-channel constant shift

    w = params["w"]                            # (COUT, 3, 3, 3) OIHW
    w_data = jnp.einsum("ocij,c->ijo", w, a)   # (kh, kw, COUT): data-path taps
    w_shift = jnp.einsum("ocij,c->ijo", w, d)  # (kh, kw, COUT): shift-path taps

    # Banded weights, merged over the 3 kernel rows into one (3*Wp, W*COUT) matrix:
    # wb[kh*Wp + p, j*COUT + o] = w_data[kh, p-j, o] for p-j in {0,1,2}.
    sel = np.zeros((KSIZE, Wp, W), np.float32)
    for kw in range(KSIZE):
        sel[kw, np.arange(W) + kw, np.arange(W)] = 1.0
    wb = jnp.einsum("kpj,hko->hpjo", jnp.asarray(sel), w_data)
    wb = wb.reshape(KSIZE * Wp, W * COUT).astype(jnp.bfloat16)

    # Conv constant map: bias + shift contribution of every in-bounds tap (exact at
    # the zero-padded border).  It cancels in loss[0]; for loss[1] it is folded with
    # the eval-BN affine so the kernel never adds it to the conv output.
    ones_pad = jnp.pad(jnp.ones((H, W), jnp.float32), 1)
    base = jnp.broadcast_to(params["b"][None, None, :], (H, W, COUT))
    for kh in range(KSIZE):
        for kw in range(KSIZE):
            base = base + (ones_pad[kh:kh + H, kw:kw + W, None]
                           * w_shift[kh, kw][None, None, :])

    scale = params["gamma"] / jnp.sqrt(params["r_var"] + BN_EPS)
    shift = params["beta"] - params["r_mean"] * scale
    bn_base = (base * scale[None, None, :]
               + shift[None, None, :]).reshape(1, H, W * COUT)
    sc_t = jnp.tile(scale, W).reshape(1, 1, W * COUT)
    return wb, sc_t, bn_base


def _pick_tiling(N):
    """Generation-aware batch tile and VMEM limit (v5e/v6e: 128 MiB, v7x: 64 MiB)."""
    try:
        vmem_cap = int(getattr(pltpu.get_tpu_info(), "vmem_capacity_bytes",
                               64 * 1024 * 1024))
    except Exception:
        vmem_cap = 64 * 1024 * 1024
    if vmem_cap >= 100 * 1024 * 1024:          # v5e / v6e
        n_block_max, vmem_limit = 16, 100 * 1024 * 1024
    else:                                       # v7x (64 MiB per TensorCore)
        n_block_max, vmem_limit = 8, 40 * 1024 * 1024
    n_block = min(N, n_block_max)
    if N > 1:
        # Keep the "parallel" grid >= 2 so both v7x TensorCores get work.
        n_block = min(n_block, -(-N // 2))
    grid = -(-N // n_block)
    return n_block, grid, vmem_limit


def cifar_mse_forward(x, y, params):
    B, K, C, H, W = x.shape
    # TODO(synk): only the C==1 path of torch's expand(-1, 3, -1, -1) is folded; a
    # genuine 3-channel input would need the per-channel conv kept unfused.
    assert C == 1, "preprocessing fold assumes 1-channel inputs (expand -> 3 channels)"
    N = B * K
    Wp = W + 2

    n_block, grid, vmem_limit = _pick_tiling(N)
    n_pad = grid * n_block

    # Raw 1-channel images, spatial zero-pad only; zero-padded extra batch entries
    # contribute exactly 0 to both partial sums (acc == 0 for x and y alike).
    def prep(t):
        t = t.reshape(N, H, W).astype(jnp.float32)
        t = jnp.pad(t, ((0, n_pad - N), (1, 1), (1, 1)))
        # Pre-stack the 3 kernel-row-shifted slabs -> conv LHS, no in-kernel relayout.
        t = jnp.concatenate([t[:, kh:kh + H, :] for kh in range(KSIZE)], axis=-1)
        return t.reshape(grid, n_block, H, KSIZE * Wp)

    lhs = jnp.concatenate([prep(x), prep(y)], axis=1)          # (grid, 2*nb, H, 3*Wp)
    lhs = lhs.reshape(grid * 2 * n_block * H, KSIZE * Wp).astype(jnp.bfloat16)

    wb, sc_t, bn_base = _fold_params(params, H, W)

    rows = 2 * n_block * H
    partial = pl.pallas_call(
        functools.partial(_cifar_mse_kernel, h=H),
        out_shape=jax.ShapeDtypeStruct((grid, 8, 128), jnp.float32),
        grid=(grid,),
        in_specs=[
            pl.BlockSpec((rows, KSIZE * Wp), lambda i: (i, 0)),
            pl.BlockSpec((KSIZE * Wp, W * COUT), lambda i: (0, 0)),
            pl.BlockSpec((1, 1, W * COUT), lambda i: (0, 0, 0)),
            pl.BlockSpec((1, H, W * COUT), lambda i: (0, 0, 0)),
        ],
        out_specs=pl.BlockSpec((1, 8, 128), lambda i: (i, 0, 0)),
        compiler_params=pltpu.CompilerParams(
            dimension_semantics=("parallel",),   # independent partial sums per tile
            vmem_limit_bytes=vmem_limit,
        ),
    )(lhs, wb, sc_t, bn_base)

    sums = jnp.sum(partial[:, 0, :], axis=0)      # lanes 0/1 hold the raw |.| sums
    count = jnp.float32(N * H * W * COUT)         # true element count (ignores pad)
    return (sums[0] + sums[1]) * 0.5 / count


def cifar_mse_reference(x, y, params):
    """Pure-JAX reference mirroring the PyTorch forward (sanity check)."""
    B, K, C, H, W = x.shape

    def prep(t):
        t = t.reshape(B * K, C, H, W)
        t = jnp.broadcast_to(t, (B * K, CIN, H, W))
        t = t / 2.0 + 0.5
        return (t - _CIFAR_MEAN[None, :, None, None]) / _CIFAR_STD[None, :, None, None]

    xn, yn = prep(x), prep(y)
    conv = lambda t: jax.lax.conv_general_dilated(
        t, params["w"], (1, 1), ((1, 1), (1, 1)),
        dimension_numbers=("NCHW", "OIHW", "NCHW"),
        precision=jax.lax.Precision.HIGHEST) + params["b"][None, :, None, None]
    xc, yc = conv(xn), conv(yn)
    l1 = jnp.mean(jnp.abs(xc - yc))
    scale = params["gamma"] / jnp.sqrt(params["r_var"] + BN_EPS)
    shift = params["beta"] - params["r_mean"] * scale
    bnrelu = lambda t: jnp.maximum(
        t * scale[None, :, None, None] + shift[None, :, None, None], 0.0)
    l2 = jnp.mean(jnp.abs(bnrelu(xc) - bnrelu(yc)))
    return (l1 + l2) / 2.0


if __name__ == "__main__":
    key = jax.random.PRNGKey(0)
    kx, ky, kp = jax.random.split(key, 3)
    # (B, K, 1, H, W) -> flatten(0,1) -> expand to 3 channels, as in CIFARMSE.forward
    x = jax.random.normal(kx, (2, 2, 1, 16, 16), jnp.float32)
    y = jax.random.normal(ky, (2, 2, 1, 16, 16), jnp.float32)
    params = init_params(kp)

    loss = jax.jit(cifar_mse_forward)(x, y, params)
    loss = jax.block_until_ready(loss)

    ref = cifar_mse_reference(x, y, params)
    np.testing.assert_allclose(np.asarray(loss), np.asarray(ref), rtol=2e-2, atol=1e-3)

    print("KERNEL_OK")
</pallas_src>

<mosaic_0001>
module attributes {stable_mosaic.version = 11 : i64} {
  func.func @_cifar_mse_kernel(%arg0: i32, %arg1: memref<64x54xbf16, #tpu.memory_space<vmem>>, %arg2: memref<54x1024xbf16, #tpu.memory_space<vmem>>, %arg3: memref<1x1x1024xf32, #tpu.memory_space<vmem>>, %arg4: memref<1x16x1024xf32, #tpu.memory_space<vmem>>, %arg5: memref<1x8x128xf32, #tpu.memory_space<vmem>>) attributes {dimension_semantics = [#tpu.dimension_semantics<parallel>], iteration_bounds = array<i64: 2>, scalar_prefetch = 0 : i64, scratch_operands = 0 : i64, tpu.core_type = #tpu.core_type<tc>, window_params = [{transform_indices = @transform_0, window_bounds = array<i64: 64, 54>}, {pipeline_mode = #tpu.pipeline_mode<synchronous>, transform_indices = @transform_1, window_bounds = array<i64: 54, 1024>}, {pipeline_mode = #tpu.pipeline_mode<synchronous>, transform_indices = @transform_2, window_bounds = array<i64: 1, 1, 1024>}, {pipeline_mode = #tpu.pipeline_mode<synchronous>, transform_indices = @transform_3, window_bounds = array<i64: 1, 16, 1024>}, {transform_indices = @transform_4, window_bounds = array<i64: 1, 8, 128>}]} {
    %c0 = arith.constant 0 : index
    %c0_0 = arith.constant 0 : index
    %0 = vector.load %arg1[%c0, %c0_0] : memref<64x54xbf16, #tpu.memory_space<vmem>>, vector<64x54xbf16>
    %c0_1 = arith.constant 0 : index
    %c0_2 = arith.constant 0 : index
    %1 = vector.load %arg2[%c0_1, %c0_2] : memref<54x1024xbf16, #tpu.memory_space<vmem>>, vector<54x1024xbf16>
    %cst = arith.constant dense<0.000000e+00> : vector<64x1024xf32>
    %2 = tpu.matmul %0, %1, %cst {dimension_numbers = #tpu.dot_dimension_numbers<[1], [0], [0], [1], [0, 0, 1, 1], [], []>} : vector<64x54xbf16>, vector<54x1024xbf16>, vector<64x1024xf32> -> vector<64x1024xf32>
    %3 = vector.shape_cast %2 : vector<64x1024xf32> to vector<4x16x1024xf32>
    %4 = vector.extract_strided_slice %3 {offsets = [0, 0, 0], sizes = [2, 16, 1024], strides = [1, 1, 1]} : vector<4x16x1024xf32> to vector<2x16x1024xf32>
    %5 = vector.extract_strided_slice %3 {offsets = [2, 0, 0], sizes = [2, 16, 1024], strides = [1, 1, 1]} : vector<4x16x1024xf32> to vector<2x16x1024xf32>
    %6 = arith.subf %4, %5 : vector<2x16x1024xf32>
    %7 = math.absf %6 : vector<2x16x1024xf32>
    %8 = vector.shape_cast %7 : vector<2x16x1024xf32> to vector<1x2x16x1024xf32>
    %cst_3 = arith.constant dense<0.000000e+00> : vector<1xf32>
    %9 = vector.multi_reduction <add>, %8, %cst_3 [1, 2, 3] : vector<1x2x16x1024xf32> to vector<1xf32>
    %10 = vector.shape_cast %9 : vector<1xf32> to vector<1x1x1x1xf32>
    %11 = vector.extract %10[0, 0, 0, 0] : f32 from vector<1x1x1x1xf32>
    %c0_4 = arith.constant 0 : index
    %c0_5 = arith.constant 0 : index
    %c0_6 = arith.constant 0 : index
    %12 = vector.load %arg3[%c0_4, %c0_5, %c0_6] : memref<1x1x1024xf32, #tpu.memory_space<vmem>>, vector<1x1x1024xf32>
    %c0_7 = arith.constant 0 : index
    %c0_8 = arith.constant 0 : index
    %c0_9 = arith.constant 0 : index
    %13 = vector.load %arg4[%c0_7, %c0_8, %c0_9] : memref<1x16x1024xf32, #tpu.memory_space<vmem>>, vector<1x16x1024xf32>
    %14 = vector.broadcast %12 : vector<1x1x1024xf32> to vector<2x16x1024xf32>
    %15 = arith.mulf %4, %14 : vector<2x16x1024xf32>
    %16 = vector.broadcast %13 : vector<1x16x1024xf32> to vector<2x16x1024xf32>
    %17 = arith.addf %15, %16 : vector<2x16x1024xf32>
    %cst_10 = arith.constant 0.000000e+00 : f32
    %18 = vector.broadcast %cst_10 : f32 to vector<2x16x1024xf32>
    %19 = arith.maximumf %17, %18 : vector<2x16x1024xf32>
    %20 = vector.broadcast %12 : vector<1x1x1024xf32> to vector<2x16x1024xf32>
    %21 = arith.mulf %5, %20 : vector<2x16x1024xf32>
    %22 = vector.broadcast %13 : vector<1x16x1024xf32> to vector<2x16x1024xf32>
    %23 = arith.addf %21, %22 : vector<2x16x1024xf32>
    %cst_11 = arith.constant 0.000000e+00 : f32
    %24 = vector.broadcast %cst_11 : f32 to vector<2x16x1024xf32>
    %25 = arith.maximumf %23, %24 : vector<2x16x1024xf32>
    %26 = arith.subf %19, %25 : vector<2x16x1024xf32>
    %27 = math.absf %26 : vector<2x16x1024xf32>
    %28 = vector.shape_cast %27 : vector<2x16x1024xf32> to vector<1x2x16x1024xf32>
    %cst_12 = arith.constant dense<0.000000e+00> : vector<1xf32>
    %29 = vector.multi_reduction <add>, %28, %cst_12 [1, 2, 3] : vector<1x2x16x1024xf32> to vector<1xf32>
    %30 = vector.shape_cast %29 : vector<1xf32> to vector<1x1x1x1xf32>
    %31 = vector.extract %30[0, 0, 0, 0] : f32 from vector<1x1x1x1xf32>
    %32 = tpu.iota {dimensions = array<i32: 2>} : vector<1x8x128xi32>
    %c0_i32 = arith.constant 0 : i32
    %33 = vector.broadcast %c0_i32 : i32 to vector<1x8x128xi32>
    %34 = arith.cmpi eq, %32, %33 : vector<1x8x128xi32>
    %c1_i32 = arith.constant 1 : i32
    %35 = vector.broadcast %c1_i32 : i32 to vector<1x8x128xi32>
    %36 = arith.cmpi eq, %32, %35 : vector<1x8x128xi32>
    %cst_13 = arith.constant 0.000000e+00 : f32
    %37 = vector.broadcast %31 : f32 to vector<1x8x128xf32>
    %38 = vector.broadcast %cst_13 : f32 to vector<1x8x128xf32>
    %39 = arith.select %36, %37, %38 : vector<1x8x128xi1>, vector<1x8x128xf32>
    %40 = vector.broadcast %11 : f32 to vector<1x8x128xf32>
    %41 = arith.select %34, %40, %39 : vector<1x8x128xi1>, vector<1x8x128xf32>
    %c0_14 = arith.constant 0 : index
    %c0_15 = arith.constant 0 : index
    %c0_16 = arith.constant 0 : index
    %42 = vector.load %arg5[%c0_14, %c0_15, %c0_16] : memref<1x8x128xf32, #tpu.memory_space<vmem>>, vector<1x8x128xf32>
    tpu.vector_store %arg5[%c0_14, %c0_15, %c0_16], %41 {strides = array<i32>} : memref<1x8x128xf32, #tpu.memory_space<vmem>>, vector<1x8x128xf32>,
    return
  }
  func.func @transform_0(%arg0: i32) -> (i32, i32) {
    %c0_i32 = arith.constant 0 : i32
    %c0_i32_0 = arith.constant 0 : i32
    return %arg0, %c0_i32 : i32, i32
  }
  func.func @transform_1(%arg0: i32) -> (i32, i32) {
    %c0_i32 = arith.constant 0 : i32
    %c0_i32_0 = arith.constant 0 : i32
    %c0_i32_1 = arith.constant 0 : i32
    return %c0_i32, %c0_i32_0 : i32, i32
  }
  func.func @transform_2(%arg0: i32) -> (i32, i32, i32) {
    %c0_i32 = arith.constant 0 : i32
    %c0_i32_0 = arith.constant 0 : i32
    %c0_i32_1 = arith.constant 0 : i32
    %c0_i32_2 = arith.constant 0 : i32
    return %c0_i32, %c0_i32_0, %c0_i32_1 : i32, i32, i32
  }
  func.func @transform_3(%arg0: i32) -> (i32, i32, i32) {
    %c0_i32 = arith.constant 0 : i32
    %c0_i32_0 = arith.constant 0 : i32
    %c0_i32_1 = arith.constant 0 : i32
    %c0_i32_2 = arith.constant 0 : i32
    return %c0_i32, %c0_i32_0, %c0_i32_1 : i32, i32, i32
  }
  func.func @transform_4(%arg0: i32) -> (i32, i32, i32) {
    %c0_i32 = arith.constant 0 : i32
    %c0_i32_0 = arith.constant 0 : i32
    %c0_i32_1 = arith.constant 0 : i32
    return %arg0, %c0_i32, %c0_i32_0 : i32, i32, i32
  }
}

</mosaic_0001>

<bundles_post_ra>
// kernel: tile.9
= control target key start
LH: loop header
LB: loop body
LE: loop exit
PB: predicated region body
PF: predicated region fallthrough
CT: control target
= control target key end

     0   :  { %vm3_vm0 = vcmask 523264   ;;  %vm10_vm1 = vcmask 1048064   ;;  %s116_s0 = inlined_call_operand.vmem [shape: f32[16,64], index: 0, kind: input, shape index: {}]   ;;  %s117_s1 = inlined_call_operand.vmem [shape: f32[1,1,1024], index: 1, kind: output, shape index: {}]  }
   0x1   :  { %v66_v0 = vld [vmem:[%s116_s0 + $0x1] ss:$2 sm:$0xff]   ;;  %v2_v1 = vld [vmem:[%s116_s0] ss:$2 sm:$0xff]   ;;  %s75_s0 = smov 64  }
   0x2   :  { %8 = vrot.lane.b32.xlu0 %v66_v0, %s75_s0  ;;  %4 = vst.msk [vmem:[#allocation0] ss:$8 sm:$0xf] %vm3_vm0, %v2_v1   ;;  %5 = vst.msk [vmem:[#allocation0] ss:$8 sm:$0xf0] %vm3_vm0, %v2_v1  }
  0x74   :  { %v9_v2 = vpop.permute.xlu0 %8  }
  0x75   :  { %11 = vst.msk [vmem:[#allocation0] ss:$8 sm:$0xf] %vm10_vm1, %v9_v2   ;;  %12 = vst.msk [vmem:[#allocation0] ss:$8 sm:$0xf0] %vm10_vm1, %v9_v2  }
  0x7c   :  { %v16_v3 = vld [vmem:[#allocation0] sm:$0x1]  ;;  %v20_v4 = vld [vmem:[#allocation0 + $0x8] sm:$0x1]  ;;  %v25_v5 = vld [vmem:[#allocation0 + $0x10] sm:$0x1] }
  0x7d   :  { %18 = vst [vmem:[%s117_s1] sm:$0x1] %v16_v3  ;;  %67 = vst [vmem:[%s117_s1 + $0x1] sm:$0x1] %v20_v4  ;;  %v31_v6 = vld [vmem:[#allocation0 + $0x18] sm:$0x1] }
  0x7e   :  { %68 = vst [vmem:[%s117_s1 + $0x2] sm:$0x1] %v25_v5  ;;  %v37_v7 = vld [vmem:[#allocation0 + $0x20] sm:$0x1]  ;;  %v43_v8 = vld [vmem:[#allocation0 + $0x28] sm:$0x1] }
  0x7f   :  { %69 = vst [vmem:[%s117_s1 + $0x3] sm:$0x1] %v31_v6  ;;  %70 = vst [vmem:[%s117_s1 + $0x4] sm:$0x1] %v37_v7  ;;  %v49_v9 = vld [vmem:[#allocation0 + $0x30] sm:$0x1] }
  0x80   :  { %71 = vst [vmem:[%s117_s1 + $0x5] sm:$0x1] %v43_v8  ;;  %v55_v10 = vld [vmem:[#allocation0 + $0x38] sm:$0x1]  ;;  %72 = vst [vmem:[%s117_s1 + $0x6] sm:$0x1] %v49_v9 }
  0x81   :  { %73 = vst [vmem:[%s117_s1 + $0x7] sm:$0x1] %v55_v10 }

// kernel: cifar_mse_forward.1
= control target key start
LH: loop header
LB: loop body
LE: loop exit
PB: predicated region body
PF: predicated region fallthrough
CT: control target
= control target key end

     0   :  { %s1370_s15 = smov 0   ;;  %s2237_s0 = inlined_call_operand.vmem [shape: bf16[128,54], index: 0, kind: input, shape index: {}]   ;;  %s2238_s1 = inlined_call_operand.vmem [shape: bf16[54,1024], index: 1, kind: input, shape index: {}]   ;;  %s2239_s2 = inlined_call_operand.vmem [shape: f32[1,1,1024], index: 2, kind: input, shape index: {}]   ;;  %s2240_s3 = inlined_call_operand.vmem [shape: f32[1,16,1024], index: 3, kind: input, shape index: {}]   ;;  %s2241_s4 = inlined_call_operand.vmem [shape: f32[2,8,128], index: 4, kind: output, shape index: {}]  }
   0x1 LB: > { %s1376_s16 = sadd.s32 4294967295, %s1342_s15   ;;  %p1249_p0 = scmp.ge.s32.totalorder %s1342_s15, 1  ;;  %s1342_s15 = sphi %s1370_s15, %s14_s15  }
   0x2   : > { %p163_p1 = scmp.lt.s32.totalorder %s1342_s15, 3 }
   0x4   : > { %p164_p2 = pnand %p1249_p0, %p163_p1 }
   0x6   : > { %167 = sbr.rel (%p164_p2) target bundleno = 578 (0x242), region = 36 }
   0xd   : > { %v207_v0 = vld [vmem:[%s2238_s1] sm:$0xff]  ;;  %v208_v2 = vld [vmem:[%s2238_s1 + $0x8] sm:$0xff]  ;;  %s1250_s23 = sshll.u32 %s1376_s16, 3  ;;  %v1344_v8 = vmov 0   ;;  %vm408_vm0 = vcmask 1042432   ;;  %v209_v31 = vld [vmem:[%s2238_s1 + $0x10] sm:$0xff] }
   0xe   : > { %v211_v1 = vld [vmem:[%s2238_s1 + $0x20] sm:$0xff]  ;;  %v212_v4 = vld [vmem:[%s2238_s1 + $0x28] sm:$0xff]  ;;  %465 = vmatprep.mubr.bf16.mxu0 %v1344_v8  ;;  %538 = vmatprep.mubr.bf16.mxu1 %v1344_v8  ;;  %p189_p3 = scmp.lt.s32.totalorder %s1250_s23, 15  ;;  %v213_v32 = vld [vmem:[%s2238_s1 + $0x30] sm:$0xff]  ;;  %vm395_vm1 = vcmask 441344   ;;  %p194_p4 = scmp.lt.s32.totalorder %s1376_s16, 1 }
   0xf   : > { %v1258_v3 = vcombine.high %v207_v0, %v211_v1  ;;  %v1257_v5 = vcombine.low %v207_v0, %v211_v1  ;;  %v215_v6 = vld [vmem:[%s2238_s1 + $0x40] sm:$0xff]  ;;  %v1260_v9 = vcombine.high %v208_v2, %v212_v4  ;;  %v1259_v10 = vcombine.low %v208_v2, %v212_v4  ;;  %v216_v12 = vld [vmem:[%s2238_s1 + $0x48] sm:$0xff]  ;;  %v210_v33 = vld [vmem:[%s2238_s1 + $0x18] sm:$0xff] }
  0x10   : > { %v219_v7 = vld [vmem:[%s2238_s1 + $0x60] sm:$0xff]  ;;  %v220_v13 = vld [vmem:[%s2238_s1 + $0x68] sm:$0xff]  ;;  %s2381_s23 = smov (!%p189_p3, %s1250_s23), 15  ;;  %v214_v34 = vld [vmem:[%s2238_s1 + $0x38] sm:$0xff]  ;;  %v1262_v36 = vcombine.high %v209_v31, %v213_v32  ;;  %v1261_v42 = vcombine.low %v209_v31, %v213_v32  ;;  %s2383_s16 = smov (!%p194_p4, %s1376_s16), 1 }
  0x11   : > { %v1266_v11 = vcombine.high %v215_v6, %v219_v7  ;;  %v223_v14 = vld [vmem:[%s2238_s1 + $0x80] sm:$0xff]  ;;  %433 = vmatprep.subr.bf16.mxu0 %v1258_v3  ;;  %v1268_v15 = vcombine.high %v216_v12, %v220_v13  ;;  %v224_v17 = vld [vmem:[%s2238_s1 + $0x88] sm:$0xff]  ;;  %506 = vmatprep.subr.bf16.mxu1 %v1260_v9  ;;  %v1265_v19 = vcombine.low %v215_v6, %v219_v7  ;;  %s1251_s18 = sshll.u32 %s2381_s23, 2  ;;  %v217_v40 = vld [vmem:[%s2238_s1 + $0x50] sm:$0xff]  ;;  %s1252_s14 = sshll.u32 %s2383_s16, 3 }
  0x12   : > { %v227_v16 = vld [vmem:[%s2238_s1 + $0xa0] sm:$0xff]  ;;  %v228_v18 = vld [vmem:[%s2238_s1 + $0xa8] sm:$0xff]  ;;  %434 = vmatpush1.bf16.msra.mxu0 %v1257_v5  ;;  %507 = vmatpush1.bf16.msra.mxu1 %v1259_v10  ;;  %v1267_v20 = vcombine.low %v216_v12, %v220_v13  ;;  %s1425_s24 = scalar_lea.vmem %s2237_s0, %s1251_s18  ;;  %v1264_v38 = vcombine.high %v210_v33, %v214_v34  ;;  %v221_v41 = vld [vmem:[%s2238_s1 + $0x70] sm:$0xff]  ;;  %v1263_v45 = vcombine.low %v210_v33, %v214_v34  ;;  %v2242_v5 = vlaneseq  ;;  %s197_s21 = scalar_lea.vmem %s2241_s4, %s1252_s14 }
  0x13   : > { %435 = vmatprep.subr.bf16.mxu0 %v1266_v11  ;;  %v1274_v21 = vcombine.high %v223_v14, %v227_v16  ;;  %508 = vmatprep.subr.bf16.mxu1 %v1268_v15  ;;  %v1276_v22 = vcombine.high %v224_v17, %v228_v18  ;;  %v231_v23 = vld [vmem:[%s2238_s1 + $0xc0] sm:$0x77]  ;;  %v232_v24 = vld [vmem:[%s2238_s1 + $0xc8] sm:$0x77]  ;;  %v1273_v25 = vcombine.low %v223_v14, %v227_v16  ;;  %v218_v43 = vld [vmem:[%s2238_s1 + $0x58] sm:$0xff] }
  0x14   : > { %v1275_v26 = vcombine.low %v224_v17, %v228_v18  ;;  %v1282_v27 = vcombine.high %v231_v23, %v231_v23  ;;  %v1281_v28 = vcombine.low %v231_v23, %v231_v23  ;;  %v1284_v29 = vcombine.high %v232_v24, %v232_v24  ;;  %v1447_v39 = vld [vmem:[%s1425_s24] sm:$0xff]   ;;  %v222_v44 = vld [vmem:[%s2238_s1 + $0x78] sm:$0xff]  ;;  %v225_v47 = vld [vmem:[%s2238_s1 + $0x90] sm:$0xff] }
  0x15   : > { %v1283_v30 = vcombine.low %v232_v24, %v232_v24  ;;  %v1270_v46 = vcombine.high %v217_v40, %v221_v41  ;;  %v229_v48 = vld [vmem:[%s2238_s1 + $0xb0] sm:$0xff]  ;;  %v1272_v49 = vcombine.high %v218_v43, %v222_v44  ;;  %v226_v50 = vld [vmem:[%s2238_s1 + $0x98] sm:$0xff]  ;;  %v1269_v52 = vcombine.low %v217_v40, %v221_v41  ;;  %v1329_v56 = vld [vmem:[%s1425_s24 + $0x8] sm:$0xff]  }
  0x16   : > { %436 = vmatpush1.bf16.msra.mxu0 %v1265_v19  ;;  %509 = vmatpush1.bf16.msra.mxu1 %v1267_v20  ;;  %v410_v35 = vsel %vm408_vm0, %v1281_v28, 0  ;;  %v230_v51 = vld [vmem:[%s2238_s1 + $0xb8] sm:$0xff]  ;;  %v1271_v53 = vcombine.low %v218_v43, %v222_v44  ;;  %v1278_v54 = vcombine.high %v225_v47, %v229_v48  ;;  %v233_v57 = vld [vmem:[%s2238_s1 + $0xd0] sm:$0x77]  ;;  %v1277_v59 = vcombine.low %v225_v47, %v229_v48  ;;  %v1527_v9 = vld [vmem:[%s2239_s2] sm:$0xff] }
  0x17   : > { %437 = vmatprep.subr.bf16.mxu0 %v1274_v21  ;;  %510 = vmatprep.subr.bf16.mxu1 %v1276_v22  ;;  %v416_v37 = vsel %vm408_vm0, %v1283_v30, 0  ;;  %v1280_v55 = vcombine.high %v226_v50, %v230_v51  ;;  %v234_v58 = vld [vmem:[%s2238_s1 + $0xd8] sm:$0x77]  ;;  %v1279_v60 = vcombine.low %v226_v50, %v230_v51  ;;  %v1286_v61 = vcombine.high %v233_v57, %v233_v57  ;;  %v1330_v2 = vld [vmem:[%s1425_s24 + $0x10] sm:$0xff]   ;;  %v1583_v31 = vld [vmem:[%s2240_s3 + $0x40] sm:$0xff] }
  0x18   : > { %v1285_v62 = vcombine.low %v233_v57, %v233_v57  ;;  %v1288_v63 = vcombine.high %v234_v58, %v234_v58  ;;  %v1287_v0 = vcombine.low %v234_v58, %v234_v58  ;;  %v1331_v4 = vld [vmem:[%s1425_s24 + $0x18] sm:$0xff]   ;;  %v1521_v6 = vshrl.u32 %v2242_v5, 7  ;;  %v1588_v32 = vld [vmem:[%s2240_s3 + $0x10] sm:$0xff] }
  0x19   : > { %v1595_v34 = vld [vmem:[%s2240_s3 + $0x18] sm:$0xff] }
  0x1a   : > { %438 = vmatpush1.bf16.msra.mxu0 %v1273_v25  ;;  %511 = vmatpush1.bf16.msra.mxu1 %v1275_v26  ;;  %v422_v1 = vsel %vm408_vm0, %v1285_v62, 0  ;;  %v428_v3 = vsel %vm408_vm0, %v1287_v0, 0  ;;  %v849_v7 = vsub.s32 0, %v1521_v6  ;;  %v853_v10 = vsub.s32 1, %v1521_v6  ;;  %v1565_v25 = vld [vmem:[%s2240_s3] sm:$0xff]  ;;  %v1570_v26 = vld [vmem:[%s2240_s3 + $0x8] sm:$0xff] }
  0x1b   : > { %1289 = vmatprep.subr.msk.bf16.mxu0 %vm408_vm0, %v1282_v27  ;;  %1294 = vmatprep.subr.msk.bf16.mxu1 %vm408_vm0, %v1284_v29  ;;  %v857_v11 = vsub.s32 2, %v1521_v6  ;;  %v1616_v40 = vld [vmem:[%s2240_s3 + $0x58] sm:$0xff]  ;;  %v865_v43 = vsub.s32 4, %v1521_v6  ;;  %v869_v47 = vsub.s32 5, %v1521_v6 }
  0x1c   : > { %v1539_v15 = vrot.slane %v1527_v9, %v849_v7  ;;  %v1546_v18 = vrot.slane %v1527_v9, %v853_v10 }
  0x1d   : > { %v1549_v19 = vrot.slane %v1527_v9, %v857_v11 }
  0x1e   : > { %440 = vmatpush1.bf16.msra.mxu0 %v410_v35  ;;  %513 = vmatpush1.bf16.msra.mxu1 %v416_v37 }
  0x1f   : > { %579 = vmatprep.subr.bf16.mxu0 %v1262_v36  ;;  %652 = vmatprep.subr.bf16.mxu1 %v1264_v38  ;;  %v1606_v38 = vld [vmem:[%s2240_s3 + $0x48] sm:$0xff] }
  0x21   : > { %1290 = vmatmul.mubr.msk.bf16.vlgmr.msra.gmra.mrb[0].mxu0 %vm395_vm1, %v1447_v39  ;;  %1295 = vmatmul.mubr.msk.bf16.vlgmr.msra.gmra.mrb[0].mxu1 %vm395_vm1, %v1447_v39 }
  0x22   : > { %580 = vmatpush1.bf16.msra.mxu0 %v1261_v42  ;;  %653 = vmatpush1.bf16.msra.mxu1 %v1263_v45 }
  0x23   : > { %475 = vmatprep.mubr.bf16.mxu0 %v1344_v8  ;;  %548 = vmatprep.mubr.bf16.mxu1 %v1344_v8 }
  0x24   : > { %581 = vmatprep.subr.bf16.mxu0 %v1270_v46  ;;  %654 = vmatprep.subr.bf16.mxu1 %v1272_v49 }
  0x26   : > { %582 = vmatpush1.bf16.msra.mxu0 %v1269_v52  ;;  %655 = vmatpush1.bf16.msra.mxu1 %v1271_v53 }
  0x27   : > { %583 = vmatprep.subr.bf16.mxu0 %v1278_v54  ;;  %656 = vmatprep.subr.bf16.mxu1 %v1280_v55 }
  0x29   : > { %1291 = vmatmul.mubr.msk.bf16.gmra.mrb[4].mxu0 %vm395_vm1, %v1329_v56  ;;  %1296 = vmatmul.mubr.msk.bf16.gmra.mrb[4].mxu1 %vm395_vm1, %v1329_v56 }
  0x2a   : > { %485 = vmatprep.mubr.bf16.mxu0 %v1344_v8  ;;  %558 = vmatprep.mubr.bf16.mxu1 %v1344_v8 }
  0x2b   : > { %584 = vmatpush1.bf16.msra.mxu0 %v1277_v59  ;;  %657 = vmatpush1.bf16.msra.mxu1 %v1279_v60  ;;  %v1655_v59 = vrot.slane %v1527_v9, %v865_v43 }
  0x2c   : > { %1299 = vmatprep.subr.msk.bf16.mxu0 %vm408_vm0, %v1286_v61  ;;  %1304 = vmatprep.subr.msk.bf16.mxu1 %vm408_vm0, %v1288_v63  ;;  %v1658_v61 = vrot.slane %v1527_v9, %v869_v47 }
  0x2d   : > { %2276 = vst [vmem:[#allocation7_spill] sm:$0xff] %v1655_v59 }
  0x2e   : > { %2277 = vst [vmem:[#allocation8_spill] sm:$0xff] %v1658_v61 }
  0x2f   : > { %586 = vmatpush1.bf16.msra.mxu0 %v422_v1  ;;  %659 = vmatpush1.bf16.msra.mxu1 %v428_v3 }
  0x31   : > { %1292 = vmatmul.mubr.msk.bf16.gmra.mrb[8].mxu0 %vm395_vm1, %v1330_v2  ;;  %1297 = vmatmul.mubr.msk.bf16.gmra.mrb[8].mxu1 %vm395_vm1, %v1330_v2 }
  0x32   : > { %495 = vmatprep.mubr.bf16.mxu0 %v1344_v8  ;;  %568 = vmatprep.mubr.bf16.mxu1 %v1344_v8 }
  0x39   : > { %1293 = vmatmul.mubr.msk.bf16.gmra.mrb[12].mxu0 %vm395_vm1, %v1331_v4  ;;  %1298 = vmatmul.mubr.msk.bf16.gmra.mrb[12].mxu1 %vm395_vm1, %v1331_v4 }
  0x3a   : > { %611 = vmatprep.mubr.bf16.mxu0 %v1344_v8  ;;  %684 = vmatprep.mubr.bf16.mxu1 %v1344_v8 }
  0x41   : > { %1300 = vmatmul.mubr.msk.bf16.vlgmr.msra.gmra.mrb[16].mxu0 %vm395_vm1, %v1447_v39  ;;  %1305 = vmatmul.mubr.msk.bf16.vlgmr.msra.gmra.mrb[16].mxu1 %vm395_vm1, %v1447_v39  ;;  %v1611_v39 = vld [vmem:[%s2240_s3 + $0x50] sm:$0xff] }
  0x42   : > { %621 = vmatprep.mubr.bf16.mxu0 %v1344_v8  ;;  %694 = vmatprep.mubr.bf16.mxu1 %v1344_v8 }
  0x49   : > { %1301 = vmatmul.mubr.msk.bf16.gmra.mrb[20].mxu0 %vm395_vm1, %v1329_v56  ;;  %1306 = vmatmul.mubr.msk.bf16.gmra.mrb[20].mxu1 %vm395_vm1, %v1329_v56 }
  0x4a   : > { %631 = vmatprep.mubr.bf16.mxu0 %v1344_v8  ;;  %704 = vmatprep.mubr.bf16.mxu1 %v1344_v8 }
  0x51   : > { %1302 = vmatmul.mubr.msk.bf16.gmra.mrb[24].mxu0 %vm395_vm1, %v1330_v2  ;;  %1307 = vmatmul.mubr.msk.bf16.gmra.mrb[24].mxu1 %vm395_vm1, %v1330_v2 }
  0x52   : > { %641 = vmatprep.mubr.bf16.mxu0 %v1344_v8  ;;  %714 = vmatprep.mubr.bf16.mxu1 %v1344_v8  ;;  %v861_v8 = vsub.s32 3, %v1521_v6 }
  0x54   : > { %v1554_v21 = vrot.slane %v1527_v9, %v861_v8 }
  0x59   : > { %1303 = vmatmul.mubr.msk.bf16.gmra.mrb[28].mxu0 %vm395_vm1, %v1331_v4  ;;  %1308 = vmatmul.mubr.msk.bf16.gmra.mrb[28].mxu1 %vm395_vm1, %v1331_v4 }
  0xf4   : > { %v1532_v12 = vpop.f32.mrb[0].mxu0  ;;  %v1536_v14 = vpop.f32.mrb[0].mxu1 }
  0xf5   : > { %v1534_v13 = vpop.f32.mrb[1].mxu0  ;;  %v1543_v17 = vpop.f32.mrb[1].mxu1  ;;  %v887_v24 = vmul.f32 %v1539_v15, %v1532_v12  ;;  %v889_v29 = vmul.f32 %v1549_v19, %v1536_v14 }
  0xf6   : > { %v1541_v16 = vpop.f32.mrb[2].mxu0  ;;  %v1556_v22 = vpop.f32.mrb[2].mxu1  ;;  %v888_v27 = vmul.f32 %v1546_v18, %v1534_v13  ;;  %v890_v30 = vmul.f32 %v1554_v21, %v1543_v17 }
  0xf7   : > { %v1551_v20 = vpop.f32.mrb[3].mxu0  ;;  %v1558_v23 = vpop.f32.mrb[3].mxu1  ;;  %v895_v28 = vmul.f32 %v1539_v15, %v1541_v16  ;;  %v897_v35 = vmul.f32 %v1549_v19, %v1556_v22  ;;  %v919_v44 = vadd.f32 %v887_v24, %v1565_v25  ;;  %v921_v50 = vadd.f32 %v889_v29, %v1588_v32 }
  0xf8   : > { %v896_v33 = vmul.f32 %v1546_v18, %v1551_v20  ;;  %v898_v36 = vmul.f32 %v1554_v21, %v1558_v23  ;;  %v920_v48 = vadd.f32 %v888_v27, %v1570_v26  ;;  %v1635_v51 = vadd.f32 %v890_v30, %v1595_v34 }
  0xf9   : > { %v1631_v49 = vadd.f32 %v895_v28, %v1583_v31  ;;  %v1645_v55 = vadd.f32 %v897_v35, %v1611_v39  ;;  %v951_v60 = vmax.f32 %v919_v44, 0.0  ;;  %v953_v2 = vmax.f32 %v921_v50, 0.0 }
  0xfa   : > { %v1642_v54 = vadd.f32 %v896_v33, %v1606_v38  ;;  %v1648_v56 = vadd.f32 %v898_v36, %v1616_v40  ;;  %v952_v0 = vmax.f32 %v920_v48, 0.0  ;;  %v954_v3 = vmax.f32 %v1635_v51, 0.0 }
  0xfc   : > { %v1601_v37 = vpop.f32.mrb[4].mxu0  ;;  %v1620_v42 = vpop.f32.mrb[4].mxu1 }
  0xfd   : > { %v1618_v41 = vpop.f32.mrb[5].mxu0  ;;  %v1626_v46 = vpop.f32.mrb[5].mxu1  ;;  %v903_v58 = vmul.f32 %v1539_v15, %v1601_v37  ;;  %v905_v27 = vmul.f32 %v1549_v19, %v1620_v42 }
  0xfe   : > { %v1624_v45 = vpop.f32.mrb[6].mxu0  ;;  %2272 = vst [vmem:[#allocation3_spill] sm:$0xff] %v1626_v46  ;;  %v1639_v53 = vpop.f32.mrb[6].mxu1  ;;  %v904_v11 = vmul.f32 %v1546_v18, %v1618_v41 }
  0xff   : > { %2271 = vst [vmem:[#allocation2_spill] sm:$0xff] %v1624_v45  ;;  %v1637_v52 = vpop.f32.mrb[7].mxu0  ;;  %2274 = vst [vmem:[#allocation5_spill] sm:$0xff] %v1639_v53  ;;  %v1650_v57 = vpop.f32.mrb[7].mxu1  ;;  %v1670_v24 = vadd.f32 %v903_v58, %v1565_v25 }
 0x100   : > { %2273 = vst [vmem:[#allocation4_spill] sm:$0xff] %v1637_v52  ;;  %2275 = vst [vmem:[#allocation6_spill] sm:$0xff] %v1650_v57 }
 0x104   : > { %v487_v8 = vpop.f32.mrb[8].mxu0  ;;  %v560_v30 = vpop.f32.mrb[8].mxu1 }
 0x105   : > { %v725_v28 = vsub.f32 %v1532_v12, %v487_v8  ;;  %v983_v29 = vmul.f32 %v1539_v15, %v487_v8  ;;  %v489_v33 = vpop.f32.mrb[9].mxu0  ;;  %v727_v35 = vsub.f32 %v1536_v14, %v560_v30  ;;  %v985_v36 = vmul.f32 %v1549_v19, %v560_v30  ;;  %v562_v47 = vpop.f32.mrb[9].mxu1 }
 0x106   : > { %v726_v43 = vsub.f32 %v1534_v13, %v489_v33  ;;  %v984_v44 = vmul.f32 %v1546_v18, %v489_v33  ;;  %v1680_v48 = vpop.f32.mrb[10].mxu0  ;;  %v728_v12 = vsub.f32 %v1543_v17, %v562_v47  ;;  %v986_v58 = vmul.f32 %v1554_v21, %v562_v47  ;;  %v1685_v8 = vpop.f32.mrb[10].mxu1 }
 0x107   : > { %v757_v50 = vand.u32 2147483647, %v725_v28  ;;  %v1015_v51 = vadd.f32 %v983_v29, %v1565_v25  ;;  %v1687_v5 = vpop.f32.mrb[11].mxu0  ;;  %v1691_v14 = vmul.f32 %v1539_v15, %v1624_v45  ;;  %v1017_v13 = vadd.f32 %v985_v36, %v1588_v32  ;;  %v1695_v28 = vpop.f32.mrb[11].mxu1 }
 0x108   : > { %v758_v30 = vand.u32 2147483647, %v726_v43  ;;  %v1016_v33 = vadd.f32 %v984_v44, %v1570_v26  ;;  %v759_v63 = vand.u32 2147483647, %v727_v35  ;;  %v1018_v17 = vadd.f32 %v986_v58, %v1595_v34 }
 0x109   : > { %v1047_v29 = vmax.f32 %v1015_v51, 0.0  ;;  %v1049_v62 = vmax.f32 %v1017_v13, 0.0  ;;  %v991_v7 = vmul.f32 %v1539_v15, %v1680_v48  ;;  %v760_v36 = vand.u32 2147483647, %v728_v12 }
 0x10a   : > { %v789_v10 = vadd.f32 %v758_v30, %v757_v50  ;;  %v1048_v4 = vmax.f32 %v1016_v33, 0.0  ;;  %v1050_v43 = vmax.f32 %v1018_v17, 0.0  ;;  %v906_v50 = vmul.f32 %v1554_v21, %v1626_v46 }
 0x10b   : > { %v1079_v1 = vsub.f32 %v951_v60, %v1047_v29  ;;  %v1081_v61 = vsub.f32 %v953_v2, %v1049_v62  ;;  %v1023_v58 = vadd.f32 %v991_v7, %v1583_v31  ;;  %v993_v60 = vmul.f32 %v1549_v19, %v1685_v8 }
 0x10c   : > { %v1080_v51 = vsub.f32 %v952_v0, %v1048_v4  ;;  %v790_v35 = vadd.f32 %v789_v10, %v759_v63  ;;  %v1705_v59 = vpop.f32.mrb[12].mxu0  ;;  %v1082_v30 = vsub.f32 %v954_v3, %v1050_v43  ;;  %v1711_v12 = vpop.f32.mrb[12].mxu1  ;;  %v1716_v62 = vadd.f32 %v904_v11, %v1570_v26 }
 0x10d   : > { %v1111_v13 = vand.u32 2147483647, %v1079_v1  ;;  %v1713_v33 = vpop.f32.mrb[13].mxu0  ;;  %v1055_v2 = vmax.f32 %v1023_v58, 0.0  ;;  %v1720_v4 = vpop.f32.mrb[13].mxu1  ;;  %v1025_v1 = vadd.f32 %v993_v60, %v1611_v39  ;;  %v992_v10 = vmul.f32 %v1546_v18, %v1687_v5 }
 0x10e   : > { %2278 = vst [vmem:[#allocation9_spill] sm:$0xff] %v1713_v33  ;;  %v1112_v63 = vand.u32 2147483647, %v1080_v51  ;;  %v1718_v0 = vadd.f32 %v790_v35, %v760_v36  ;;  %v1113_v7 = vand.u32 2147483647, %v1081_v61  ;;  %v1727_v29 = vpop.f32.mrb[14].mxu0  ;;  %v994_v51 = vmul.f32 %v1554_v21, %v1695_v28 }
 0x10f   : > { %2280 = vst [vmem:[#allocation11_spill] sm:$0xff] %v1727_v29  ;;  %v1729_v17 = vpop.f32.mrb[14].mxu1  ;;  %v2282_v36 = vmax.f32 %v1631_v49, 0.0  ;;  %v1739_v35 = vpop.f32.mrb[15].mxu0  ;;  %v937_v60 = vadd.f32 %v905_v27, %v1588_v32  ;;  %v1057_v3 = vmax.f32 %v1025_v1, 0.0  ;;  %v1024_v44 = vadd.f32 %v992_v10, %v1606_v38 }
 0x110   : > { %2279 = vst [vmem:[#allocation10_spill] sm:$0xff] %v1718_v0  ;;  %2281 = vst [vmem:[#allocation12_spill] sm:$0xff] %v1729_v17  ;;  %v1143_v11 = vadd.f32 %v1112_v63, %v1111_v13  ;;  %v1741_v58 = vpop.f32.mrb[15].mxu1  ;;  %v912_v13 = vmul.f32 %v1546_v18, %v1637_v52  ;;  %v1114_v63 = vand.u32 2147483647, %v1082_v30  ;;  %v913_v61 = vmul.f32 %v1549_v19, %v1639_v53 }
 0x111   : > { %v1733_v43 = vsub.f32 %v2282_v36, %v1055_v2  ;;  %2284 = vst [vmem:[#allocation14_spill] sm:$0xff] %v1739_v35  ;;  %2285 = vst [vmem:[#allocation15_spill] sm:$0xff] %v1741_v58  ;;  %v1026_v36 = vadd.f32 %v994_v51, %v1616_v40  ;;  %v2286_v47 = vmax.f32 %v1645_v55, 0.0  ;;  %v1056_v27 = vmax.f32 %v1024_v44, 0.0 }
 0x112   : > { %v1144_v2 = vadd.f32 %v1143_v11, %v1113_v7  ;;  %v999_v1 = vmul.f32 %v1539_v15, %v1705_v59  ;;  %v1001_v7 = vmul.f32 %v1549_v19, %v1711_v12  ;;  %v967_v51 = vmax.f32 %v1670_v24, 0.0 }
 0x113   : > { %2283 = vst [vmem:[#allocation13_spill] sm:$0xff] %v1733_v43  ;;  %v1754_v0 = vsub.f32 %v2286_v47, %v1057_v3  ;;  %v1058_v49 = vmax.f32 %v1026_v36, 0.0  ;;  %v2289_v55 = vmax.f32 %v1642_v54, 0.0  ;;  %v943_v36 = vadd.f32 %v1691_v14, %v1583_v31 }
 0x114   : > { %v1758_v10 = vadd.f32 %v1144_v2, %v1114_v63  ;;  %v1764_v11 = vpop.f32.mrb[16].mxu0  ;;  %v1031_v44 = vadd.f32 %v999_v1, %v1565_v25  ;;  %v1776_v2 = vpop.f32.mrb[16].mxu1  ;;  %v2291_v30 = vmax.f32 %v1648_v56, 0.0  ;;  %v1033_v54 = vadd.f32 %v1001_v7, %v1588_v32 }
 0x115   : > { %2287 = vst [vmem:[#allocation16_spill] sm:$0xff] %v1754_v0  ;;  %v1769_v47 = vsub.f32 %v2289_v55, %v1056_v27  ;;  %v1774_v63 = vpop.f32.mrb[17].mxu0  ;;  %v1000_v24 = vmul.f32 %v1546_v18, %v1713_v33  ;;  %v1789_v27 = vpop.f32.mrb[17].mxu1  ;;  %v938_v1 = vadd.f32 %v906_v50, %v1595_v34  ;;  %v914_v55 = vmul.f32 %v1554_v21, %v1650_v57 }
 0x116   : > { %2288 = vst [vmem:[#allocation17_spill] sm:$0xff] %v1758_v10  ;;  %v1782_v10 = vsub.f32 %v2291_v30, %v1058_v49  ;;  %v1787_v25 = vpop.f32.mrb[18].mxu0  ;;  %v1063_v3 = vmax.f32 %v1031_v44, 0.0  ;;  %v969_v49 = vmax.f32 %v937_v60, 0.0  ;;  %v1065_v32 = vmax.f32 %v1033_v54, 0.0 }
 0x117   : > { %2290 = vst [vmem:[#allocation18_spill] sm:$0xff] %v1769_v47  ;;  %v1796_v14 = vpop.f32.mrb[19].mxu0  ;;  %v1032_v30 = vadd.f32 %v1000_v24, %v1570_v26  ;;  %v1002_v7 = vmul.f32 %v1554_v21, %v1720_v4  ;;  %v968_v50 = vmax.f32 %v1716_v62, 0.0  ;;  %v1007_v56 = vmul.f32 %v1539_v15, %v1727_v29 }
 0x118   : > { %2292 = vst [vmem:[#allocation19_spill] sm:$0xff] %v1782_v10  ;;  %v1801_v10 = vpop.f32.mrb[18].mxu1  ;;  %v1804_v33 = vsub.f32 %v967_v51, %v1063_v3  ;;  %v1812_v60 = vsub.f32 %v969_v49, %v1065_v32  ;;  %v944_v62 = vadd.f32 %v912_v13, %v1606_v38  ;;  %v945_v51 = vadd.f32 %v913_v61, %v1611_v39 }
 0x119   : > { %v1810_v46 = vpop.f32.mrb[19].mxu1  ;;  %v1064_v26 = vmax.f32 %v1032_v30, 0.0  ;;  %v1034_v54 = vadd.f32 %v1002_v7, %v1595_v34  ;;  %v1039_v3 = vadd.f32 %v1007_v56, %v1583_v31  ;;  %v1009_v44 = vmul.f32 %v1549_v19, %v1729_v17 }
 0x11a   : > { %2293 = vst [vmem:[#allocation20_spill] sm:$0xff] %v1804_v33  ;;  %2294 = vst [vmem:[#allocation21_spill] sm:$0xff] %v1812_v60  ;;  %v975_v15 = vmax.f32 %v943_v36, 0.0  ;;  %v970_v29 = vmax.f32 %v938_v1, 0.0  ;;  %v1008_v61 = vmul.f32 %v1546_v18, %v1739_v35  ;;  %v946_v19 = vadd.f32 %v914_v55, %v1616_v40  ;;  %v1995_v60 = vld [vmem:[%s2240_s3 + $0x78] sm:$0xff] }
 0x11b   : > { %v1822_v45 = vsub.f32 %v968_v50, %v1064_v26  ;;  %v1066_v49 = vmax.f32 %v1034_v54, 0.0  ;;  %v1071_v34 = vmax.f32 %v1039_v3, 0.0  ;;  %v1041_v30 = vadd.f32 %v1009_v44, %v1611_v39 }
 0x11c   : > { %v1824_v32 = vpop.f32.mrb[20].mxu0  ;;  %v1833_v56 = vpop.f32.mrb[20].mxu1  ;;  %v1010_v39 = vmul.f32 %v1554_v21, %v1741_v58  ;;  %v977_v44 = vmax.f32 %v945_v51, 0.0  ;;  %v1040_v54 = vadd.f32 %v1008_v61, %v1606_v38  ;;  %v976_v24 = vmax.f32 %v944_v62, 0.0 }
 0x11d   : > { %2295 = vst [vmem:[#allocation22_spill] sm:$0xff] %v1822_v45  ;;  %v1831_v31 = vpop.f32.mrb[21].mxu0  ;;  %v1836_v36 = vsub.f32 %v970_v29, %v1066_v49  ;;  %v1844_v50 = vpop.f32.mrb[21].mxu1  ;;  %v1846_v18 = vsub.f32 %v975_v15, %v1071_v34  ;;  %v1073_v26 = vmax.f32 %v1041_v30, 0.0  ;;  %v2301_v49 = vsub.s32 6, %v1521_v6 }
 0x11e   : > { %2296 = vst [vmem:[#allocation23_spill] sm:$0xff] %v1831_v31  ;;  %v1842_v7 = vpop.f32.mrb[22].mxu0  ;;  %v1851_v29 = vpop.f32.mrb[22].mxu1  ;;  %v1042_v55 = vadd.f32 %v1010_v39, %v1616_v40  ;;  %v1072_v15 = vmax.f32 %v1040_v54, 0.0  ;;  %v2304_v34 = vsub.s32 7, %v1521_v6  ;;  %v978_v30 = vmax.f32 %v946_v19, 0.0 }
 0x11f   : > { %2297 = vst [vmem:[#allocation24_spill] sm:$0xff] %v1836_v36  ;;  %2298 = vst [vmem:[#allocation25_spill] sm:$0xff] %v1842_v7  ;;  %v1849_v3 = vpop.f32.mrb[23].mxu0  ;;  %v1857_v21 = vrot.slane %v1527_v9, %v2301_v49  ;;  %v1859_v1 = vpop.f32.mrb[23].mxu1  ;;  %v1861_v51 = vsub.f32 %v977_v44, %v1073_v26  ;;  %v1871_v40 = vld [vmem:[%s2240_s3 + $0x20] sm:$0xff]  ;;  %v2305_v39 = vld [vmem:[#allocation7_spill] sm:$0xff]  ;;  %v2306_v62 = vsub.f32 %v1541_v16, %v1680_v48 }
 0x120   : > { %2299 = vst [vmem:[#allocation26_spill] sm:$0xff] %v1846_v18  ;;  %2300 = vst [vmem:[#allocation27_spill] sm:$0xff] %v1849_v3  ;;  %v1866_v38 = vrot.slane %v1527_v9, %v2304_v34  ;;  %v1074_v61 = vmax.f32 %v1042_v55, 0.0  ;;  %v891_v49 = vmul.f32 %v2305_v39, %v1764_v11  ;;  %v1880_v26 = vsub.f32 %v976_v24, %v1072_v15  ;;  %v1885_v6 = vld [vmem:[%s2240_s3 + $0x28] sm:$0xff]  ;;  %v2308_v9 = vld [vmem:[#allocation8_spill] sm:$0xff] }
 0x121   : > { %2302 = vst [vmem:[#allocation28_spill] sm:$0xff] %v1859_v1  ;;  %2303 = vst [vmem:[#allocation29_spill] sm:$0xff] %v1861_v51  ;;  %v1878_v44 = vand.u32 2147483647, %v2306_v62  ;;  %v892_v19 = vmul.f32 %v2308_v9, %v1774_v63  ;;  %v1892_v54 = vld [vmem:[%s2240_s3 + $0x60] sm:$0xff]  ;;  %v899_v16 = vmul.f32 %v2305_v39, %v1787_v25  ;;  %v1899_v48 = vld [vmem:[%s2240_s3 + $0x30] sm:$0xff]  ;;  %v2309_v24 = vsub.f32 %v1556_v22, %v1685_v8 }
 0x122   : > { %2307 = vst [vmem:[#allocation7_spill] sm:$0xff] %v1880_v26  ;;  %v1906_v15 = vsub.f32 %v978_v30, %v1074_v61  ;;  %v893_v34 = vmul.f32 %v1857_v21, %v1776_v2  ;;  %v1913_v62 = vld [vmem:[%s2240_s3 + $0x68] sm:$0xff]  ;;  %v900_v13 = vmul.f32 %v2308_v9, %v1796_v14  ;;  %v1920_v51 = vld [vmem:[%s2240_s3 + $0x38] sm:$0xff]  ;;  %v1925_v22 = vld [vmem:[%s2240_s3 + $0x70] sm:$0xff]  ;;  %v2311_v61 = vsub.f32 %v1551_v20, %v1687_v5 }
 0x123   : > { %v1904_v55 = vand.u32 2147483647, %v2309_v24  ;;  %v2312_v58 = vsub.f32 %v1558_v23, %v1695_v28  ;;  %v2313_v17 = vsub.f32 %v1601_v37, %v1705_v59  ;;  %v1946_v30 = vadd.f32 %v891_v49, %v1871_v40 }
 0x124   : > { %2310 = vst [vmem:[#allocation8_spill] sm:$0xff] %v1906_v15  ;;  %v633_v8 = vpop.f32.mrb[24].mxu0  ;;  %v1931_v24 = vand.u32 2147483647, %v2311_v61  ;;  %v894_v15 = vmul.f32 %v1866_v38, %v1789_v27  ;;  %v706_v26 = vpop.f32.mrb[24].mxu1  ;;  %v901_v5 = vmul.f32 %v1857_v21, %v1801_v10  ;;  %v2315_v23 = vsub.f32 %v1620_v42, %v1711_v12 }
 0x125   : > { %v635_v18 = vpop.f32.mrb[25].mxu0  ;;  %v1938_v57 = vand.u32 2147483647, %v2312_v58  ;;  %v1943_v53 = vand.u32 2147483647, %v2313_v17  ;;  %v1950_v20 = vpop.f32.mrb[25].mxu1  ;;  %v1961_v37 = vadd.f32 %v892_v19, %v1885_v6  ;;  %v1964_v59 = vadd.f32 %v899_v16, %v1892_v54 }
 0x126   : > { %v1952_v61 = vpop.f32.mrb[26].mxu0  ;;  %v1958_v28 = vand.u32 2147483647, %v2315_v23  ;;  %v1966_v17 = vpop.f32.mrb[26].mxu1  ;;  %v925_v49 = vadd.f32 %v893_v34, %v1899_v48  ;;  %v1972_v52 = vadd.f32 %v900_v13, %v1913_v62  ;;  %v902_v42 = vmul.f32 %v1866_v38, %v1810_v46  ;;  %v2317_v23 = vld [vmem:[#allocation9_spill] sm:$0xff] }
 0x127   : > { %2314 = vst [vmem:[#allocation30_spill] sm:$0xff] %v1943_v53  ;;  %v1968_v58 = vpop.f32.mrb[27].mxu0  ;;  %v907_v12 = vmul.f32 %v2305_v39, %v1824_v32  ;;  %v1978_v19 = vpop.f32.mrb[27].mxu1  ;;  %v2318_v35 = vsub.f32 %v1618_v41, %v2317_v23  ;;  %v1987_v34 = vadd.f32 %v894_v15, %v1920_v51  ;;  %v1990_v13 = vadd.f32 %v901_v5, %v1925_v22 }
 0x128   : > { %2316 = vst [vmem:[#allocation31_spill] sm:$0xff] %v1958_v28  ;;  %v2321_v28 = vld [vmem:[#allocation3_spill] sm:$0xff]  ;;  %v955_v41 = vmax.f32 %v1946_v30, 0.0  ;;  %v956_v15 = vmax.f32 %v1961_v37, 0.0  ;;  %v915_v23 = vmul.f32 %v2305_v39, %v1842_v7  ;;  %v909_v33 = vmul.f32 %v1857_v21, %v1833_v56 }
 0x129   : > { %v1984_v36 = vand.u32 2147483647, %v2318_v35  ;;  %v2322_v16 = vsub.f32 %v2321_v28, %v1720_v4  ;;  %v908_v35 = vmul.f32 %v2308_v9, %v1831_v31  ;;  %v2014_v28 = vadd.f32 %v902_v42, %v1995_v60  ;;  %v2329_v31 = vld [vmem:[#allocation10_spill] sm:$0xff] }
 0x12a   : > { %v2017_v30 = vadd.f32 %v907_v12, %v1871_v40  ;;  %v958_v37 = vmax.f32 %v1987_v34, 0.0  ;;  %v729_v45 = vsub.f32 %v1764_v11, %v633_v8  ;;  %v987_v12 = vmul.f32 %v2305_v39, %v633_v8 }
 0x12b   : > { %2319 = vst [vmem:[#allocation9_spill] sm:$0xff] %v1984_v36  ;;  %v2001_v53 = vand.u32 2147483647, %v2322_v16  ;;  %v957_v36 = vmax.f32 %v925_v49, 0.0  ;;  %v2031_v42 = vadd.f32 %v908_v35, %v1885_v6  ;;  %v731_v7 = vsub.f32 %v1776_v2, %v706_v26 }
 0x12c   : > { %v2019_v16 = vpop.f32.mrb[28].mxu0  ;;  %v2026_v49 = vpop.f32.mrb[28].mxu1  ;;  %v989_v34 = vmul.f32 %v1857_v21, %v706_v26  ;;  %v2044_v11 = vadd.f32 %v909_v33, %v1899_v48  ;;  %v761_v1 = vand.u32 2147483647, %v729_v45  ;;  %v730_v35 = vsub.f32 %v1774_v63, %v635_v18 }
 0x12d   : > { %2323 = vst [vmem:[#allocation3_spill] sm:$0xff] %v2001_v53  ;;  %v916_v53 = vmul.f32 %v2308_v9, %v1849_v3  ;;  %v2028_v4 = vpop.f32.mrb[29].mxu0  ;;  %v2036_v0 = vpop.f32.mrb[29].mxu1  ;;  %v2041_v3 = vadd.f32 %v915_v23, %v1892_v54  ;;  %v988_v63 = vmul.f32 %v2308_v9, %v635_v18  ;;  %v990_v26 = vmul.f32 %v1866_v38, %v1950_v20 }
 0x12e   : > { %2324 = vst [vmem:[#allocation32_spill] sm:$0xff] %v2028_v4  ;;  %2325 = vst [vmem:[#allocation33_spill] sm:$0xff] %v2036_v0  ;;  %v2038_v5 = vpop.f32.mrb[30].mxu0  ;;  %v2047_v47 = vpop.f32.mrb[30].mxu1  ;;  %v1019_v0 = vadd.f32 %v987_v12, %v1871_v40  ;;  %v792_v33 = vadd.f32 %v2329_v31, %v761_v1  ;;  %v763_v4 = vand.u32 2147483647, %v731_v7  ;;  %v995_v31 = vmul.f32 %v2305_v39, %v1952_v61 }
 0x12f   : > { %2326 = vst [vmem:[#allocation34_spill] sm:$0xff] %v2038_v5  ;;  %2327 = vst [vmem:[#allocation35_spill] sm:$0xff] %v2047_v47  ;;  %v2049_v8 = vpop.f32.mrb[31].mxu0  ;;  %v1021_v5 = vadd.f32 %v989_v34, %v1899_v48  ;;  %v2055_v23 = vpop.f32.mrb[31].mxu1  ;;  %v762_v45 = vand.u32 2147483647, %v730_v35  ;;  %v1020_v12 = vadd.f32 %v988_v63, %v1885_v6  ;;  %v737_v34 = vsub.f32 %v1787_v25, %v1952_v61 }
 0x130   : > { %2328 = vst [vmem:[#allocation36_spill] sm:$0xff] %v2049_v8  ;;  %v1051_v43 = vmax.f32 %v1019_v0, 0.0  ;;  %v732_v8 = vsub.f32 %v1789_v27, %v1950_v20  ;;  %v2069_v1 = vadd.f32 %v916_v53, %v1913_v62  ;;  %v1022_v18 = vadd.f32 %v990_v26, %v1920_v51 }
 0x131   : > { %v1053_v47 = vmax.f32 %v1021_v5, 0.0  ;;  %v793_v2 = vadd.f32 %v792_v33, %v762_v45  ;;  %v1052_v27 = vmax.f32 %v1020_v12, 0.0  ;;  %v1027_v20 = vadd.f32 %v995_v31, %v1892_v54 }
 0x132   : > { %2330 = vst [vmem:[#allocation10_spill] sm:$0xff] %v2069_v1  ;;  %v1083_v0 = vsub.f32 %v955_v41, %v1051_v43  ;;  %v764_v5 = vand.u32 2147483647, %v732_v8  ;;  %v910_v33 = vmul.f32 %v1866_v38, %v1844_v50  ;;  %v1054_v25 = vmax.f32 %v1022_v18, 0.0 }
 0x133   : > { %v1085_v7 = vsub.f32 %v957_v36, %v1053_v47  ;;  %v794_v35 = vadd.f32 %v793_v2, %v763_v4  ;;  %v739_v61 = vsub.f32 %v1801_v10, %v1966_v17  ;;  %v1084_v63 = vsub.f32 %v956_v15, %v1052_v27  ;;  %v2331_v36 = vld [vmem:[#allocation17_spill] sm:$0xff] }
 0x134   : > { %v1115_v45 = vand.u32 2147483647, %v1083_v0  ;;  %v1059_v1 = vmax.f32 %v1027_v20, 0.0  ;;  %v997_v43 = vmul.f32 %v1857_v21, %v1966_v17  ;;  %v972_v47 = vmax.f32 %v2031_v42, 0.0 }
 0x135   : > { %v795_v53 = vadd.f32 %v794_v35, %v764_v5  ;;  %v1086_v4 = vsub.f32 %v958_v37, %v1054_v25  ;;  %v738_v8 = vsub.f32 %v1796_v14, %v1968_v58  ;;  %v1116_v2 = vand.u32 2147483647, %v1084_v63 }
 0x136   : > { %v1146_v41 = vadd.f32 %v2331_v36, %v1115_v45  ;;  %v2332_v12 = vmax.f32 %v1964_v59, 0.0  ;;  %v1029_v15 = vadd.f32 %v997_v43, %v1925_v22  ;;  %v979_v31 = vmax.f32 %v2041_v3, 0.0 }
 0x137   : > { %v796_v26 = vadd.f32 %v795_v53, %v1878_v44  ;;  %v973_v17 = vmax.f32 %v2044_v11, 0.0  ;;  %v996_v0 = vmul.f32 %v2308_v9, %v1968_v58  ;;  %v740_v37 = vsub.f32 %v1810_v46, %v1978_v19 }
 0x138   : > { %v2086_v10 = vsub.f32 %v2332_v12, %v1059_v1  ;;  %v1117_v14 = vand.u32 2147483647, %v1085_v7  ;;  %v1147_v18 = vadd.f32 %v1146_v41, %v1116_v2  ;;  %v1061_v27 = vmax.f32 %v1029_v15, 0.0 }
 0x139   : > { %v797_v44 = vadd.f32 %v796_v26, %v1931_v24  ;;  %v1118_v59 = vand.u32 2147483647, %v1086_v4  ;;  %v1028_v1 = vadd.f32 %v996_v0, %v1913_v62  ;;  %v998_v5 = vmul.f32 %v1866_v38, %v1978_v19  ;;  %v2335_v26 = vld [vmem:[#allocation13_spill] sm:$0xff] }
 0x13a   : > { %v745_v11 = vsub.f32 %v1824_v32, %v2019_v16  ;;  %v1148_v35 = vadd.f32 %v1147_v18, %v1117_v14  ;;  %v2333_v20 = vmax.f32 %v1990_v13, 0.0  ;;  %v1003_v24 = vmul.f32 %v2305_v39, %v2019_v16  ;;  %v2337_v18 = vld [vmem:[#allocation32_spill] sm:$0xff]  ;;  %v2361_v16 = vld [vmem:[#allocation21_spill] sm:$0xff] }
 0x13b   : > { %v798_v58 = vadd.f32 %v797_v44, %v1904_v55  ;;  %v917_v7 = vmul.f32 %v1857_v21, %v1851_v29  ;;  %v1060_v45 = vmax.f32 %v1028_v1, 0.0  ;;  %v1030_v25 = vadd.f32 %v998_v5, %v1995_v60  ;;  %v2338_v44 = vld [vmem:[#allocation23_spill] sm:$0xff] }
 0x13c   : > { %v2104_v46 = vsub.f32 %v2333_v20, %v1061_v27  ;;  %v747_v19 = vsub.f32 %v1833_v56, %v2026_v49  ;;  %v1149_v63 = vadd.f32 %v1148_v35, %v1118_v59  ;;  %v769_v53 = vand.u32 2147483647, %v737_v34  ;;  %v2340_v59 = vld [vmem:[#allocation18_spill] sm:$0xff]  ;;  %v2366_v56 = vld [vmem:[#allocation4_spill] sm:$0xff] }
 0x13d   : > { %v799_v55 = vadd.f32 %v798_v58, %v1938_v57  ;;  %v1035_v13 = vadd.f32 %v1003_v24, %v1871_v40  ;;  %v770_v43 = vand.u32 2147483647, %v738_v8  ;;  %v2334_v36 = vmax.f32 %v1972_v52, 0.0 }
 0x13e   : > { %v1062_v4 = vmax.f32 %v1030_v25, 0.0  ;;  %v1005_v2 = vmul.f32 %v1857_v21, %v2026_v49  ;;  %v2336_v12 = vand.u32 2147483647, %v2335_v26  ;;  %v746_v34 = vsub.f32 %v2338_v44, %v2337_v18  ;;  %v2347_v26 = vld [vmem:[#allocation34_spill] sm:$0xff] }
 0x13f   : > { %v1092_v41 = vsub.f32 %v2334_v36, %v1060_v45  ;;  %v800_v0 = vadd.f32 %v799_v55, %v769_v53  ;;  %v1067_v14 = vmax.f32 %v1035_v13, 0.0  ;;  %v942_v57 = vadd.f32 %v910_v33, %v1920_v51  ;;  %v2343_v45 = vld [vmem:[#allocation28_spill] sm:$0xff]  ;;  %v2367_v49 = vld [vmem:[#allocation14_spill] sm:$0xff] }
 0x140   : > { %v1150_v15 = vadd.f32 %v1149_v63, %v2336_v12  ;;  %v2339_v40 = vmax.f32 %v2014_v28, 0.0  ;;  %v1037_v52 = vadd.f32 %v1005_v2, %v1899_v48  ;;  %v1004_v27 = vmul.f32 %v2308_v9, %v2337_v18  ;;  %v2344_v63 = vld [vmem:[#allocation33_spill] sm:$0xff]  ;;  %v2345_v53 = vld [vmem:[#allocation16_spill] sm:$0xff] }
 0x141   : > { %v2341_v1 = vand.u32 2147483647, %v2340_v59  ;;  %v771_v35 = vand.u32 2147483647, %v739_v61  ;;  %v801_v58 = vadd.f32 %v800_v0, %v770_v43  ;;  %v2342_v20 = vmax.f32 %v2017_v30, 0.0  ;;  %v2348_v12 = vld [vmem:[#allocation25_spill] sm:$0xff] }
 0x142   : > { %v1094_v8 = vsub.f32 %v2339_v40, %v1062_v4  ;;  %v918_v33 = vmul.f32 %v1866_v38, %v2343_v45  ;;  %v1069_v25 = vmax.f32 %v1037_v52, 0.0  ;;  %v1036_v28 = vadd.f32 %v1004_v27, %v1885_v6  ;;  %v2349_v6 = vld [vmem:[#allocation19_spill] sm:$0xff] }
 0x143   : > { %v1151_v5 = vadd.f32 %v1150_v15, %v2341_v1  ;;  %v2133_v24 = vsub.f32 %v2342_v20, %v1067_v14  ;;  %v748_v48 = vsub.f32 %v1844_v50, %v2344_v63  ;;  %v2346_v55 = vand.u32 2147483647, %v2345_v53  ;;  %v2355_v53 = vld [vmem:[#allocation9_spill] sm:$0xff] }
 0x144   : > { %v772_v36 = vand.u32 2147483647, %v740_v37  ;;  %v802_v4 = vadd.f32 %v801_v58, %v771_v35  ;;  %v1006_v61 = vmul.f32 %v1866_v38, %v2344_v63  ;;  %v1123_v30 = vand.u32 2147483647, %v2086_v10  ;;  %v2352_v35 = vld [vmem:[#allocation30_spill] sm:$0xff] }
 0x145   : > { %v1152_v13 = vadd.f32 %v1151_v5, %v2346_v55  ;;  %v2145_v43 = vsub.f32 %v973_v17, %v1069_v25  ;;  %v1068_v2 = vmax.f32 %v1036_v28, 0.0  ;;  %v753_v15 = vsub.f32 %v2348_v12, %v2347_v26  ;;  %v2351_v17 = vld [vmem:[#allocation35_spill] sm:$0xff] }
 0x146   : > { %v2350_v0 = vand.u32 2147483647, %v2349_v6  ;;  %v803_v40 = vadd.f32 %v802_v4, %v772_v36  ;;  %v1038_v52 = vadd.f32 %v1006_v61, %v1920_v51  ;;  %v1011_v37 = vmul.f32 %v2305_v39, %v2347_v26 }
 0x147   : > { %v974_v27 = vmax.f32 %v942_v57, 0.0  ;;  %v1124_v59 = vand.u32 2147483647, %v1092_v41  ;;  %v1100_v10 = vsub.f32 %v972_v47, %v1068_v2  ;;  %v755_v1 = vsub.f32 %v1851_v29, %v2351_v17  ;;  %v2353_v41 = vld [vmem:[#allocation36_spill] sm:$0xff]  ;;  %v2354_v57 = vld [vmem:[#allocation27_spill] sm:$0xff] }
 0x148   : > { %v1153_v14 = vadd.f32 %v1152_v13, %v2350_v0  ;;  %v804_v58 = vadd.f32 %v803_v40, %v2352_v35  ;;  %v1070_v20 = vmax.f32 %v1038_v52, 0.0  ;;  %v1043_v25 = vadd.f32 %v1011_v37, %v1892_v54  ;;  %v2357_v40 = vld [vmem:[#allocation20_spill] sm:$0xff]  ;;  %v2360_v35 = vld [vmem:[#allocation22_spill] sm:$0xff] }
 0x149   : > { %v949_v28 = vadd.f32 %v917_v7, %v1925_v22  ;;  %v1125_v51 = vand.u32 2147483647, %v2104_v46  ;;  %v1013_v39 = vmul.f32 %v1857_v21, %v2351_v17  ;;  %v754_v42 = vsub.f32 %v2354_v57, %v2353_v41 }
 0x14a   : > { %v1154_v5 = vadd.f32 %v1153_v14, %v1123_v30  ;;  %v805_v55 = vadd.f32 %v804_v58, %v2355_v53  ;;  %v1102_v13 = vsub.f32 %v974_v27, %v1070_v20  ;;  %v1075_v36 = vmax.f32 %v1043_v25, 0.0  ;;  %v2356_v30 = vld [vmem:[#allocation31_spill] sm:$0xff]  ;;  %v2359_v27 = vld [vmem:[#allocation10_spill] sm:$0xff] }
 0x14b   : > { %v950_v4 = vadd.f32 %v918_v33, %v1995_v60  ;;  %v1045_v61 = vadd.f32 %v1013_v39, %v1925_v22  ;;  %v1012_v54 = vmul.f32 %v2308_v9, %v2353_v41  ;;  %v756_v46 = vsub.f32 %v2343_v45, %v2055_v23  ;;  %v2358_v45 = vld [vmem:[#allocation3_spill] sm:$0xff] }
 0x14c   : > { %v1155_v47 = vadd.f32 %v1154_v5, %v1124_v59  ;;  %v1126_v7 = vand.u32 2147483647, %v1094_v8  ;;  %v806_v2 = vadd.f32 %v805_v55, %v2356_v30  ;;  %v2176_v6 = vsub.f32 %v979_v31, %v1075_v36  ;;  %v2364_v36 = vld [vmem:[#allocation11_spill] sm:$0xff] }
 0x14d   : > { %v981_v0 = vmax.f32 %v949_v28, 0.0  ;;  %v1077_v14 = vmax.f32 %v1045_v61, 0.0  ;;  %v1044_v33 = vadd.f32 %v1012_v54, %v1913_v62  ;;  %v1014_v22 = vmul.f32 %v1866_v38, %v2055_v23 }
 0x14e   : > { %v1156_v21 = vadd.f32 %v1155_v47, %v1125_v51  ;;  %v1127_v9 = vand.u32 2147483647, %v2357_v40  ;;  %v777_v8 = vand.u32 2147483647, %v745_v11  ;;  %v807_v37 = vadd.f32 %v806_v2, %v2358_v45  ;;  %v2362_v47 = vld [vmem:[#allocation24_spill] sm:$0xff] }
 0x14f   : > { %v980_v3 = vmax.f32 %v2359_v27, 0.0  ;;  %v1076_v31 = vmax.f32 %v1044_v33, 0.0  ;;  %v1046_v59 = vadd.f32 %v1014_v22, %v1995_v60  ;;  %v1109_v5 = vsub.f32 %v981_v0, %v1077_v14  ;;  %v2369_v33 = vld [vmem:[#allocation5_spill] sm:$0xff]  ;;  %v2370_v22 = vld [vmem:[#allocation12_spill] sm:$0xff] }
 0x150   : > { %v1157_v52 = vadd.f32 %v1156_v21, %v1126_v7  ;;  %v1128_v62 = vand.u32 2147483647, %v2360_v35  ;;  %v808_v20 = vadd.f32 %v807_v37, %v777_v8  ;;  %v778_v38 = vand.u32 2147483647, %v746_v34  ;;  %v2363_v34 = vld [vmem:[#allocation2_spill] sm:$0xff]  ;;  %v2373_v8 = vld [vmem:[#allocation15_spill] sm:$0xff] }
 0x151   : > { %v982_v23 = vmax.f32 %v950_v4, 0.0  ;;  %v1108_v25 = vsub.f32 %v980_v3, %v1076_v31  ;;  %v1078_v32 = vmax.f32 %v1046_v59, 0.0  ;;  %v1129_v11 = vand.u32 2147483647, %v2361_v16  ;;  %v2375_v31 = vld [vmem:[#allocation26_spill] sm:$0xff] }
 0x152   : > { %v1158_v58 = vadd.f32 %v1157_v52, %v1127_v9  ;;  %v779_v51 = vand.u32 2147483647, %v747_v19  ;;  %v809_v60 = vadd.f32 %v808_v20, %v778_v38  ;;  %v1130_v53 = vand.u32 2147483647, %v2362_v47  ;;  %v2372_v52 = vld [vmem:[#allocation6_spill] sm:$0xff] }
 0x153   : > { %v1110_v39 = vsub.f32 %v982_v23, %v1078_v32  ;;  %v780_v18 = vand.u32 2147483647, %v748_v48  ;;  %v2365_v4 = vsub.f32 %v2363_v34, %v2364_v36  ;;  %v1131_v54 = vand.u32 2147483647, %v2133_v24  ;;  %v2377_v32 = vld [vmem:[#allocation29_spill] sm:$0xff] }
 0x154   : > { %v1159_v28 = vadd.f32 %v1158_v58, %v1128_v62  ;;  %v810_v44 = vadd.f32 %v809_v60, %v779_v51  ;;  %v2368_v19 = vsub.f32 %v2366_v56, %v2367_v49  ;;  %v1132_v0 = vand.u32 2147483647, %v1100_v10  ;;  %v2376_v58 = vld [vmem:[#allocation7_spill] sm:$0xff]  ;;  %v2378_v51 = vld [vmem:[#allocation8_spill] sm:$0xff] }
 0x155   : > { %v781_v61 = vand.u32 2147483647, %v2365_v4  ;;  %v2371_v50 = vsub.f32 %v2369_v33, %v2370_v22  ;;  %v1133_v48 = vand.u32 2147483647, %v2145_v43  ;;  %v2374_v24 = vsub.f32 %v2372_v52, %v2373_v8 }
 0x156   : > { %v1160_v55 = vadd.f32 %v1159_v28, %v1129_v11  ;;  %v811_v21 = vadd.f32 %v810_v44, %v780_v18  ;;  %v782_v30 = vand.u32 2147483647, %v2368_v19  ;;  %v1134_v37 = vand.u32 2147483647, %v1102_v13 }
 0x157   : > { %v783_v63 = vand.u32 2147483647, %v2371_v50  ;;  %v784_v45 = vand.u32 2147483647, %v2374_v24  ;;  %v1135_v59 = vand.u32 2147483647, %v2375_v31  ;;  %v2379_v49 = vlaneseq }
 0x158   : > { %v1161_v7 = vadd.f32 %v1160_v55, %v1130_v53  ;;  %v812_v14 = vadd.f32 %v811_v21, %v781_v61  ;;  %v785_v10 = vand.u32 2147483647, %v753_v15  ;;  %v1136_v20 = vand.u32 2147483647, %v2376_v58 }
 0x159   : > { %v786_v23 = vand.u32 2147483647, %v754_v42  ;;  %v1137_v13 = vand.u32 2147483647, %v2377_v32  ;;  %v787_v11 = vand.u32 2147483647, %v755_v1 }
 0x15a   : > { %v1162_v2 = vadd.f32 %v1161_v7, %v1131_v54  ;;  %v813_v9 = vadd.f32 %v812_v14, %v782_v30  ;;  %v1138_v26 = vand.u32 2147483647, %v2378_v51  ;;  %v788_v12 = vand.u32 2147483647, %v756_v46 }
 0x15b   : > { %v1139_v47 = vand.u32 2147483647, %v2176_v6  ;;  %v1140_v18 = vand.u32 2147483647, %v1108_v25  ;;  %v1141_v57 = vand.u32 2147483647, %v1109_v5 }
 0x15c   : > { %v1163_v40 = vadd.f32 %v1162_v2, %v1132_v0  ;;  %v814_v3 = vadd.f32 %v813_v9, %v783_v63  ;;  %v1142_v44 = vand.u32 2147483647, %v1110_v39  ;;  %v1184_v19 = vand.u32 127, %v2379_v49 }
 0x15e   : > { %v1164_v27 = vadd.f32 %v1163_v40, %v1133_v48  ;;  %v815_v62 = vadd.f32 %v814_v3, %v784_v45  ;;  %vm1186_vm2 = vcmp.eq.s32.totalorder %v1184_v19, 1  ;;  %vm1185_vm3 = vcmp.eq.s32.totalorder %v1184_v19, 0 }
 0x160   : > { %v1165_v35 = vadd.f32 %v1164_v27, %v1134_v37  ;;  %v816_v38 = vadd.f32 %v815_v62, %v785_v10 }
 0x162   : > { %v1166_v43 = vadd.f32 %v1165_v35, %v1135_v59  ;;  %v817_v28 = vadd.f32 %v816_v38, %v786_v23 }
 0x164   : > { %v1167_v16 = vadd.f32 %v1166_v43, %v1136_v20  ;;  %v818_v15 = vadd.f32 %v817_v28, %v787_v11 }
 0x166   : > { %v1168_v60 = vadd.f32 %v1167_v16, %v1137_v13  ;;  %v819_v53 = vadd.f32 %v818_v15, %v788_v12 }
 0x168   : > { %v1169_v55 = vadd.f32 %v1168_v60, %v1138_v26  ;;  %820 = vadd.xlane.f32.xlu0 %v819_v53 }
 0x16a   : > { %v1170_v41 = vadd.f32 %v1169_v55, %v1139_v47 }
 0x16c   : > { %v1171_v42 = vadd.f32 %v1170_v41, %v1140_v18 }
 0x16e   : > { %v1172_v34 = vadd.f32 %v1171_v42, %v1141_v57 }
 0x170   : > { %v1173_v36 = vadd.f32 %v1172_v34, %v1142_v44 }
 0x172   : > { %1174 = vadd.xlane.f32.xlu0 %v1173_v36 }
 0x1f5   : > { %v821_v29 = vpop.xlane.xlu0 %820 }
 0x1f6   : > { %v822_v17 = vrot.slane %v821_v29, 4 }
 0x1f8   : > { %v823_v1 = vadd.f32 %v822_v17, %v821_v29 }
 0x1fa   : > { %v824_v46 = vrot.slane %v823_v1, 2 }
 0x1fc   : > { %v825_v4 = vadd.f32 %v824_v46, %v823_v1 }
 0x1fe   : > { %v826_v54 = vrot.slane %v825_v4, 1 }
 0x1ff   : > { %v1175_v61 = vpop.xlane.xlu0 %1174 }
 0x200   : > { %v1176_v6 = vrot.slane %v1175_v61, 4  ;;  %v827_v25 = vadd.f32 %v826_v54, %v825_v4 }
 0x202   : > { %v1177_v7 = vadd.f32 %v1176_v6, %v1175_v61  ;;  %1311 = vpush %v827_v25 }
 0x204   : > { %v1178_v21 = vrot.slane %v1177_v7, 2 }
 0x206   : > { %v1179_v5 = vadd.f32 %v1178_v21, %v1177_v7 }
 0x208   : > { %v1180_v56 = vrot.slane %v1179_v5, 1 }
 0x20a   : > { %v1181_v39 = vadd.f32 %v1180_v56, %v1179_v5 }
 0x20c   : > { %1313 = vpush %v1181_v39 }
 0x233   : > { %s1312_s17 = spop %1311 }
 0x234   : > { %v1189_v2 = vstv %s1312_s17 }
 0x23d   : > { %s1314_s18 = spop %1313 }
 0x23e   : > { %v1187_v30 = vstv %s1314_s18 }
 0x23f   : > { %v1188_v0 = vsel %vm1186_vm2, %v1187_v30, 0.0 }
 0x240   : > { %v1190_v14 = vsel %vm1185_vm3, %v1189_v2, %v1188_v0 }
 0x241   : > { %1191 = vst [vmem:[%s197_s21] sm:$0xff] %v1190_v14 }
 0x242 PF: > { %s14_s15 = sadd.s32 1, %s1342_s15  }
 0x243   : > { %p11_p5 = scmp.ge.s32.totalorder %s14_s15, 4  }
 0x245   :  { %13 = sbr.rel (!%p11_p5) target bundleno = 1 (0x1), region = 66 }

</bundles_post_ra>
